<compile_context>
chip_gen: v7x
topology: tpu7x:2x2x1
jax: 0.10.0
libtpu: 0.0.40
codegen_flags: <defaults>
</compile_context>

<pallas_src>
import functools

import jax
import jax.numpy as jnp
from jax.experimental import pallas as pl
from jax.experimental.pallas import tpu as pltpu

EPS = 1e-5


def _detect_vmem_limit_bytes():
    """Generation-aware VMEM request: ~3/4 of per-core VMEM, capped at 96 MiB.
    v5e/v6e (128 MiB physical) -> 96 MiB; v7x (64 MiB physical) -> 48 MiB."""
    try:
        cap = int(pltpu.get_tpu_info().vmem_capacity_bytes)
        if cap > 0:
            return min((cap * 3) // 4, 96 * 1024 * 1024)
    except Exception:
        pass
    return 48 * 1024 * 1024  # conservative fallback (assume v7x-sized VMEM)


_VMEM_LIMIT_BYTES = _detect_vmem_limit_bytes()


# -----------------------------------------------------------------------------
# Kernels
# -----------------------------------------------------------------------------
def _prenorm_whole_kernel(x_ref, g_ref, b_ref, o_ref, *, inv_n, n_pad):
    # x_ref/o_ref: (Bt, Cs, L)   g_ref/b_ref: (1, Cs, 1)
    x = x_ref[...].astype(jnp.float32)
    mean = jnp.sum(x, axis=(1, 2), keepdims=True) * inv_n        # (Bt, 1, 1)
    xc = x - mean
    ssq = jnp.sum(xc * xc, axis=(1, 2), keepdims=True)
    if n_pad:
        # zero padding contributes mean^2 per padded element to ssq; remove it.
        ssq = ssq - n_pad * (mean * mean)
    inv = jax.lax.rsqrt(ssq * inv_n + EPS)                        # (Bt, 1, 1)
    scale = inv * g_ref[...]                                      # (Bt, Cs, 1)
    # Keep the reference's (x - mean) * scale + beta association for precision.
    o_ref[...] = (xc * scale + b_ref[...]).astype(o_ref.dtype)


def _prenorm_ltiled_kernel(x_ref, g_ref, b_ref, o_ref, s1_ref, s2_ref, *, inv_n):
    # grid = (B, 2, nL).  x_ref/o_ref: (1, Cs, Lt)   g_ref/b_ref: (1, Cs, 1)
    # s1_ref/s2_ref: (1, 1, 1) f32 scratch (sum -> mean, sumsq -> inv-std).
    p = pl.program_id(1)
    l = pl.program_id(2)

    @pl.when(jnp.logical_and(p == 0, l == 0))
    def _():
        s1_ref[...] = jnp.zeros_like(s1_ref)
        s2_ref[...] = jnp.zeros_like(s2_ref)

    @pl.when(p == 0)
    def _():  # streaming sum / sum-of-squares accumulation
        xf = x_ref[...].astype(jnp.float32)
        s1_ref[...] += jnp.sum(xf, axis=(1, 2), keepdims=True)
        s2_ref[...] += jnp.sum(xf * xf, axis=(1, 2), keepdims=True)

    @pl.when(p == 1)
    def _():
        @pl.when(l == 0)
        def _():  # finalize once per sample; reuse scratch for mean / inv-std
            mean = s1_ref[...] * inv_n
            var = jnp.maximum(s2_ref[...] * inv_n - mean * mean, 0.0)
            s1_ref[...] = mean
            s2_ref[...] = jax.lax.rsqrt(var + EPS)

        mean = s1_ref[...]
        scale = s2_ref[...] * g_ref[...]                          # (1, Cs, 1)
        xf = x_ref[...].astype(jnp.float32)
        o_ref[...] = ((xf - mean) * scale + b_ref[...]).astype(o_ref.dtype)


# -----------------------------------------------------------------------------
# Layout / tiling heuristics (pure Python, trace-time)
# -----------------------------------------------------------------------------
def _pick_layout(C, HW, itemsize):
    """Return (s, L, lane_pad): kernel sees (B, C*s, L) with L % 128 == 0."""
    sub_min = {4: 8, 2: 16, 1: 32}.get(itemsize, 8)
    candidates = [s for s in range(1, HW + 1)
                  if HW % s == 0 and (HW // s) % 128 == 0]
    if candidates:
        good = [s for s in candidates if C * s >= sub_min]
        s = min(good) if good else max(candidates)
        return s, HW // s, 0
    L = ((HW + 127) // 128) * 128      # pad lane dim up to a 128 multiple
    return 1, L, L - HW


def _choose_bt(B, per_sample_elems, budget_elems):
    """Largest divisor of B fitting the budget; prefer an even grid of >=4
    steps (hides pipeline-edge DMA, feeds both v7x TCs), then even, then >=2.
    Returns 0 if even one sample does not fit (L-tiled path)."""
    fits = [bt for bt in range(1, B + 1)
            if B % bt == 0 and bt * per_sample_elems <= budget_elems]
    if not fits:
        return 0
    for pred in (lambda g: g >= 4 and g % 2 == 0,
                 lambda g: g % 2 == 0,
                 lambda g: g >= 2,
                 lambda g: True):
        cand = [bt for bt in fits if pred(B // bt)]
        if cand:
            return max(cand)
    return 1


def _choose_lt(Cs, L, budget_elems):
    """Largest multiple-of-128 divisor of L whose (Cs, Lt) block fits."""
    best = 128
    for d in range(1, L // 128 + 1):
        lt = 128 * d
        if L % lt == 0 and Cs * lt <= budget_elems:
            best = lt
    return best


# -----------------------------------------------------------------------------
# Public entry point
# -----------------------------------------------------------------------------
@functools.partial(jax.jit, static_argnames=("fn", "_max_block_elems"))
def prenorm(x, gamma, beta, fn=None, _max_block_elems=None):
    """x: (B, C, H, W) NCHW.  gamma/beta: (C,).  Returns fn(GroupNorm(1, C)(x))."""
    B, C, H, W = x.shape
    HW = H * W
    itemsize = jnp.dtype(x.dtype).itemsize

    s, L, lane_pad = _pick_layout(C, HW, itemsize)
    Cs = C * s
    n_real = C * HW                      # real elements per sample (stats divisor)
    n_pad = Cs * L - n_real
    inv_n = 1.0 / float(n_real)

    x2 = x.reshape(B, C, HW)
    if lane_pad:
        x2 = jnp.pad(x2, ((0, 0), (0, 0), (0, lane_pad)))
    x2 = x2.reshape(B, Cs, L)            # input keeps its dtype through the DMA
    g = jnp.repeat(gamma.astype(jnp.float32), s).reshape(1, Cs, 1)
    b = jnp.repeat(beta.astype(jnp.float32), s).reshape(1, Cs, 1)

    # Dtype-aware VMEM model: double-buffered in+out (4*itemsize B/elem) plus
    # ~2 live f32 temporaries inside the kernel (8 B/elem), 2 MiB slack.
    per_elem_vmem = 4 * itemsize + 8
    budget_elems = max((_VMEM_LIMIT_BYTES - (2 << 20)) // per_elem_vmem, 8 * 128)
    if _max_block_elems is not None:
        budget_elems = min(budget_elems, int(_max_block_elems))

    per_sample_elems = Cs * L
    Bt = _choose_bt(B, per_sample_elems, budget_elems)

    if Bt:
        # ---------------- whole-sample path ----------------
        grid = (B // Bt,)
        cost = pl.CostEstimate(
            flops=int(7 * B * Cs * L),
            transcendentals=int(B),
            bytes_accessed=int(2 * B * Cs * L * itemsize + 8 * Cs),
        )
        y = pl.pallas_call(
            functools.partial(_prenorm_whole_kernel, inv_n=inv_n, n_pad=n_pad),
            out_shape=jax.ShapeDtypeStruct((B, Cs, L), x.dtype),
            grid_spec=pltpu.PrefetchScalarGridSpec(
                num_scalar_prefetch=0,
                grid=grid,
                in_specs=[
                    pl.BlockSpec((Bt, Cs, L), lambda i: (i, 0, 0)),
                    pl.BlockSpec((1, Cs, 1), lambda i: (0, 0, 0)),
                    pl.BlockSpec((1, Cs, 1), lambda i: (0, 0, 0)),
                ],
                out_specs=pl.BlockSpec((Bt, Cs, L), lambda i: (i, 0, 0)),
            ),
            compiler_params=pltpu.CompilerParams(
                dimension_semantics=("parallel",),
                vmem_limit_bytes=_VMEM_LIMIT_BYTES,
            ),
            cost_estimate=cost,
        )(x2, g, b)
    else:
        # ---------------- L-tiled path (sample exceeds VMEM budget) ----------------
        Lt = _choose_lt(Cs, L, budget_elems)
        nl = L // Lt
        cost = pl.CostEstimate(
            flops=int(7 * B * Cs * L),
            transcendentals=int(B),
            bytes_accessed=int(3 * B * Cs * L * itemsize + 8 * Cs),
        )
        y = pl.pallas_call(
            functools.partial(_prenorm_ltiled_kernel, inv_n=inv_n),
            out_shape=jax.ShapeDtypeStruct((B, Cs, L), x.dtype),
            grid_spec=pltpu.PrefetchScalarGridSpec(
                num_scalar_prefetch=0,
                grid=(B, 2, nl),
                in_specs=[
                    pl.BlockSpec((1, Cs, Lt), lambda bb, p, l: (bb, 0, l)),
                    pl.BlockSpec((1, Cs, 1), lambda bb, p, l: (0, 0, 0)),
                    pl.BlockSpec((1, Cs, 1), lambda bb, p, l: (0, 0, 0)),
                ],
                # Phase 0 parks on tile (bb,0,0) (never written by the kernel);
                # phase 1 overwrites it before the index changes, so no garbage
                # writeback ever reaches HBM: 2 reads + 1 write of x total.
                out_specs=pl.BlockSpec((1, Cs, Lt), lambda bb, p, l: (bb, 0, l * p)),
                scratch_shapes=[pltpu.VMEM((1, 1, 1), jnp.float32),
                                pltpu.VMEM((1, 1, 1), jnp.float32)],
            ),
            compiler_params=pltpu.CompilerParams(
                dimension_semantics=("parallel", "arbitrary", "arbitrary"),
                vmem_limit_bytes=_VMEM_LIMIT_BYTES,
            ),
            cost_estimate=cost,
        )(x2, g, b)

    if lane_pad:
        y = y.reshape(B, C, L)[:, :, :HW]
    y = y.reshape(B, C, H, W)
    if fn is not None:
        y = fn(y)
    return y


# -----------------------------------------------------------------------------
# Validation
# -----------------------------------------------------------------------------
def _reference(x, gamma, beta):
    # Pure-JAX GroupNorm(1, C) reference.
    B, C, H, W = x.shape
    xf = x.reshape(B, -1).astype(jnp.float32)
    mean = xf.mean(axis=1, keepdims=True)
    var = ((xf - mean) ** 2).mean(axis=1, keepdims=True)
    y = ((xf - mean) / jnp.sqrt(var + EPS)).reshape(B, C, H, W)
    return y * gamma.reshape(1, C, 1, 1) + beta.reshape(1, C, 1, 1)


if __name__ == "__main__":
    key = jax.random.PRNGKey(0)
    kx, kg, kb, kx2, kx3 = jax.random.split(key, 5)

    # 1) Whole-sample path with the repacked (C*s, HW/s) layout.
    B, C, H, W = 2, 4, 16, 16
    x = jax.random.normal(kx, (B, C, H, W), dtype=jnp.float32)
    # nn.GroupNorm default init is weight=1, bias=0; perturb deterministically
    # so the affine path is actually exercised.
    gamma = 1.0 + 0.1 * jax.random.normal(kg, (C,), dtype=jnp.float32)
    beta = 0.1 * jax.random.normal(kb, (C,), dtype=jnp.float32)
    out = jax.block_until_ready(prenorm(x, gamma, beta, fn=None))  # fn = identity
    assert out.shape == (B, C, H, W)
    assert jnp.allclose(out, _reference(x, gamma, beta), atol=1e-5, rtol=1e-5), \
        "mismatch vs reference (whole-sample path)"

    # 2) Whole-sample path with lane padding (HW=25 is not a 128 multiple).
    xp = jax.random.normal(kx2, (2, 4, 5, 5), dtype=jnp.float32)
    outp = jax.block_until_ready(prenorm(xp, gamma, beta))
    assert outp.shape == xp.shape
    assert jnp.allclose(outp, _reference(xp, gamma, beta), atol=1e-5, rtol=1e-5), \
        "mismatch vs reference (padded path)"

    # 3) L-tiled path (shrink the block budget so one sample spans two L tiles).
    C3 = 8
    x3 = jax.random.normal(kx3, (1, C3, 32, 32), dtype=jnp.float32)
    g3 = 1.0 + 0.1 * jax.random.normal(kg, (C3,), dtype=jnp.float32)
    b3 = 0.1 * jax.random.normal(kb, (C3,), dtype=jnp.float32)
    out3 = jax.block_until_ready(prenorm(x3, g3, b3, _max_block_elems=4096))
    assert out3.shape == x3.shape
    assert jnp.allclose(out3, _reference(x3, g3, b3), atol=1e-4, rtol=1e-4), \
        "mismatch vs reference (L-tiled path)"

    print("KERNEL_OK")
</pallas_src>

<mosaic_0001>
module attributes {stable_mosaic.version = 11 : i64} {
  func.func @_prenorm_whole_kernel(%arg0: i32, %arg1: memref<1x8x128xf32, #tpu.memory_space<vmem>>, %arg2: memref<1x8x1xf32, #tpu.memory_space<vmem>>, %arg3: memref<1x8x1xf32, #tpu.memory_space<vmem>>, %arg4: memref<1x8x128xf32, #tpu.memory_space<vmem>>) attributes {dimension_semantics = [#tpu.dimension_semantics<parallel>], iteration_bounds = array<i64: 2>, scalar_prefetch = 0 : i64, scratch_operands = 0 : i64, tpu.core_type = #tpu.core_type<tc>, window_params = [{transform_indices = @transform_0, window_bounds = array<i64: 1, 8, 128>}, {pipeline_mode = #tpu.pipeline_mode<synchronous>, transform_indices = @transform_1, window_bounds = array<i64: 1, 8, 1>}, {pipeline_mode = #tpu.pipeline_mode<synchronous>, transform_indices = @transform_2, window_bounds = array<i64: 1, 8, 1>}, {transform_indices = @transform_3, window_bounds = array<i64: 1, 8, 128>}]} {
    %c0 = arith.constant 0 : index
    %c0_0 = arith.constant 0 : index
    %c0_1 = arith.constant 0 : index
    %0 = vector.load %arg1[%c0, %c0_0, %c0_1] : memref<1x8x128xf32, #tpu.memory_space<vmem>>, vector<1x8x128xf32>
    %cst = arith.constant dense<0.000000e+00> : vector<1xf32>
    %1 = vector.multi_reduction <add>, %0, %cst [1, 2] : vector<1x8x128xf32> to vector<1xf32>
    %2 = vector.shape_cast %1 : vector<1xf32> to vector<1x1x1xf32>
    %cst_2 = arith.constant 9.765625E-4 : f32
    %3 = vector.broadcast %cst_2 : f32 to vector<1x1x1xf32>
    %4 = arith.mulf %2, %3 : vector<1x1x1xf32>
    %5 = vector.broadcast %4 : vector<1x1x1xf32> to vector<1x8x128xf32>
    %6 = arith.subf %0, %5 : vector<1x8x128xf32>
    %7 = arith.mulf %6, %6 : vector<1x8x128xf32>
    %cst_3 = arith.constant dense<0.000000e+00> : vector<1xf32>
    %8 = vector.multi_reduction <add>, %7, %cst_3 [1, 2] : vector<1x8x128xf32> to vector<1xf32>
    %9 = vector.shape_cast %8 : vector<1xf32> to vector<1x1x1xf32>
    %cst_4 = arith.constant 9.765625E-4 : f32
    %10 = vector.broadcast %cst_4 : f32 to vector<1x1x1xf32>
    %11 = arith.mulf %9, %10 : vector<1x1x1xf32>
    %cst_5 = arith.constant 9.99999974E-6 : f32
    %12 = vector.broadcast %cst_5 : f32 to vector<1x1x1xf32>
    %13 = arith.addf %11, %12 : vector<1x1x1xf32>
    %14 = math.rsqrt %13 : vector<1x1x1xf32>
    %c0_6 = arith.constant 0 : index
    %c0_7 = arith.constant 0 : index
    %c0_8 = arith.constant 0 : index
    %15 = vector.load %arg2[%c0_6, %c0_7, %c0_8] : memref<1x8x1xf32, #tpu.memory_space<vmem>>, vector<1x8x1xf32>
    %16 = vector.broadcast %14 : vector<1x1x1xf32> to vector<1x8x1xf32>
    %17 = arith.mulf %16, %15 : vector<1x8x1xf32>
    %18 = vector.broadcast %17 : vector<1x8x1xf32> to vector<1x8x128xf32>
    %19 = arith.mulf %6, %18 : vector<1x8x128xf32>
    %c0_9 = arith.constant 0 : index
    %c0_10 = arith.constant 0 : index
    %c0_11 = arith.constant 0 : index
    %20 = vector.load %arg3[%c0_9, %c0_10, %c0_11] : memref<1x8x1xf32, #tpu.memory_space<vmem>>, vector<1x8x1xf32>
    %21 = vector.broadcast %20 : vector<1x8x1xf32> to vector<1x8x128xf32>
    %22 = arith.addf %19, %21 : vector<1x8x128xf32>
    %c0_12 = arith.constant 0 : index
    %c0_13 = arith.constant 0 : index
    %c0_14 = arith.constant 0 : index
    %23 = vector.load %arg4[%c0_12, %c0_13, %c0_14] : memref<1x8x128xf32, #tpu.memory_space<vmem>>, vector<1x8x128xf32>
    tpu.vector_store %arg4[%c0_12, %c0_13, %c0_14], %22 {strides = array<i32>} : memref<1x8x128xf32, #tpu.memory_space<vmem>>, vector<1x8x128xf32>,
    return
  }
  func.func @transform_0(%arg0: i32) -> (i32, i32, i32) {
    %c0_i32 = arith.constant 0 : i32
    %c0_i32_0 = arith.constant 0 : i32
    %c0_i32_1 = arith.constant 0 : i32
    return %arg0, %c0_i32, %c0_i32_0 : i32, i32, i32
  }
  func.func @transform_1(%arg0: i32) -> (i32, i32, i32) {
    %c0_i32 = arith.constant 0 : i32
    %c0_i32_0 = arith.constant 0 : i32
    %c0_i32_1 = arith.constant 0 : i32
    %c0_i32_2 = arith.constant 0 : i32
    return %c0_i32, %c0_i32_0, %c0_i32_1 : i32, i32, i32
  }
  func.func @transform_2(%arg0: i32) -> (i32, i32, i32) {
    %c0_i32 = arith.constant 0 : i32
    %c0_i32_0 = arith.constant 0 : i32
    %c0_i32_1 = arith.constant 0 : i32
    %c0_i32_2 = arith.constant 0 : i32
    return %c0_i32, %c0_i32_0, %c0_i32_1 : i32, i32, i32
  }
  func.func @transform_3(%arg0: i32) -> (i32, i32, i32) {
    %c0_i32 = arith.constant 0 : i32
    %c0_i32_0 = arith.constant 0 : i32
    %c0_i32_1 = arith.constant 0 : i32
    return %arg0, %c0_i32, %c0_i32_0 : i32, i32, i32
  }
}

</mosaic_0001>

<bundles_post_ra>
// kernel: prenorm.1
= control target key start
LH: loop header
LB: loop body
LE: loop exit
PB: predicated region body
PF: predicated region fallthrough
CT: control target
= control target key end

     0   :  { %s309_s12 = smov 0   ;;  %s339_s0 = inlined_call_operand.vmem [shape: f32[2,8,128], index: 0, kind: input, shape index: {}]   ;;  %s340_s1 = inlined_call_operand.vmem [shape: f32[1,8,1], index: 1, kind: input, shape index: {}]   ;;  %s341_s2 = inlined_call_operand.vmem [shape: f32[1,8,1], index: 2, kind: input, shape index: {}]   ;;  %s342_s3 = inlined_call_operand.vmem [shape: f32[2,8,128], index: 3, kind: output, shape index: {}]  }
   0x1 LB: > { %s258_s13 = sadd.s32 4294967295, %s286_s12   ;;  %p262_p0 = scmp.ge.s32.totalorder %s286_s12, 1  ;;  %s286_s12 = sphi %s309_s12, %s13_s12  }
   0x2   : > { %p136_p1 = scmp.lt.s32.totalorder %s286_s12, 3 }
   0x4   : > { %p137_p2 = pnand %p262_p0, %p136_p1 }
   0x5   : > { %p158_p3 = scmp.lt.s32.totalorder (!%p137_p2), %s258_s13, 1  ;;  %v288_v11 = vmov (!%p137_p2), 0   ;;  %v189_v21 = vld [vmem:[%s340_s1] sm:$0xff] (!%p137_p2) }
   0x6   : > { %140 = sbr.rel (%p137_p2) target bundleno = 483 (0x1e3), region = 32  ;;  %276 = vset.pattern.permute.xlu1 (!%p137_p2), %v288_v11  ;;  %277 = vset.pattern.permute.xlu0 (!%p137_p2), %v288_v11  ;;  %v197_v24 = vld [vmem:[%s341_s2] sm:$0xff] (!%p137_p2) }
   0xd   : > { %s344_s13 = smov (!%p158_p3, %s258_s13), 1 }
   0xe   : > { %s263_s14 = sshll.u32 %s344_s13, 3 }
   0xf   : > { %s161_s17 = scalar_lea.vmem %s339_s0, %s263_s14  ;;  %s165_s24 = scalar_lea.vmem %s342_s3, %s263_s14 }
  0x10   : > { %v166_v0 = vld [vmem:[%s161_s17] sm:$0xff] }
  0x11   : > { %167 = vadd.xlane.f32.xlu0 %v166_v0 }
  0x9e   : > { %v168_v1 = vpop.xlane.xlu0 %167 }
  0x9f   : > { %v169_v2 = vrot.slane %v168_v1, 4 }
  0xa1   : > { %v170_v3 = vadd.f32 %v169_v2, %v168_v1 }
  0xa3   : > { %v171_v4 = vrot.slane %v170_v3, 2 }
  0xa5   : > { %v172_v5 = vadd.f32 %v171_v4, %v170_v3 }
  0xa7   : > { %v173_v6 = vrot.slane %v172_v5, 1 }
  0xa9   : > { %v174_v7 = vadd.f32 %v173_v6, %v172_v5 }
  0xab   : > { %v175_v8 = vmul.f32 0.0009765625, %v174_v7 }
  0xad   : > { %v176_v9 = vsub.f32 %v166_v0, %v175_v8 }
  0xaf   : > { %v177_v10 = vmul.f32 %v176_v9, %v176_v9 }
  0xb1   : > { %178 = vadd.xlane.f32.xlu0 %v177_v10 }
 0x13e   : > { %v179_v12 = vpop.xlane.xlu0 %178 }
 0x13f   : > { %v180_v13 = vrot.slane %v179_v12, 4 }
 0x141   : > { %v181_v14 = vadd.f32 %v180_v13, %v179_v12 }
 0x143   : > { %v182_v15 = vrot.slane %v181_v14, 2 }
 0x145   : > { %v183_v16 = vadd.f32 %v182_v15, %v181_v14 }
 0x147   : > { %v184_v17 = vrot.slane %v183_v16, 1 }
 0x149   : > { %v185_v18 = vadd.f32 %v184_v17, %v183_v16 }
 0x14b   : > { %v186_v19 = vmul.f32 0.0009765625, %v185_v18 }
 0x14d   : > { %v187_v20 = vadd.f32 1e-05, %v186_v19 }
 0x14f   : > { %278 = vrsqrt.f32 %v187_v20 }
 0x159   : > { %v279_v22 = vpop.eup %278 }
 0x15a   : > { %v190_v23 = vmul.f32 %v279_v22, %v189_v21 }
 0x15c   : > { %193 = vperm.xlu1 %276, %v190_v23  }
 0x160   : > { %200 = vperm.xlu1 %276, %v197_v24  }
 0x1db   : > { %v194_v25 = vpop.permute.xlu1 %193 }
 0x1dc   : > { %v196_v26 = vmul.f32 %v194_v25, %v176_v9 }
 0x1df   : > { %v201_v27 = vpop.permute.xlu1 %200 }
 0x1e0   : > { %v203_v28 = vadd.f32 %v201_v27, %v196_v26 }
 0x1e2   : > { %204 = vst [vmem:[%s165_s24] sm:$0xff] %v203_v28 }
 0x1e3 PF: > { %s13_s12 = sadd.s32 1, %s286_s12  }
 0x1e4   : > { %p10_p4 = scmp.ge.s32.totalorder %s13_s12, 4  }
 0x1e6   :  { %12 = sbr.rel (!%p10_p4) target bundleno = 1 (0x1), region = 62 }

</bundles_post_ra>
